<compile_context>
chip_gen: v6e
topology: v6e:2x2x1
jax: 0.10.0
libtpu: 0.0.40
codegen_flags: <defaults>
</compile_context>

<pallas_src>
import functools

import jax
import jax.numpy as jnp
from jax.experimental import pallas as pl
from jax.experimental.pallas import tpu as pltpu


def _attention_kernel(n_s_blocks, s_block,
                      h_ref, w_ref, b_ref,
                      ctx_ref, attw_ref,
                      m_ref, l_ref, acc_ref):
    # h_ref:    (Bb, Sb, H) hidden-state tile, native dtype (H on lanes, Sb on sublanes)
    # w_ref:    (1, H)      attention weight row, f32, lane-dense
    # b_ref:    (1,)        bias scalar in SMEM
    # ctx_ref:  (Bb, H)     context output block (resident across the S axis)
    # attw_ref: (Bb, S)     attention-weight output block, lane-dense, resident across S
    # m_ref/l_ref: (Bb, 1)  online-softmax running max / running sum (f32 scratch)
    # acc_ref:  (Bb, H)     online context accumulator (f32 scratch)
    j = pl.program_id(1)

    @pl.when(j == 0)
    def _init():
        m_ref[...] = jnp.full(m_ref.shape, -jnp.inf, jnp.float32)
        l_ref[...] = jnp.zeros(l_ref.shape, jnp.float32)
        acc_ref[...] = jnp.zeros(acc_ref.shape, jnp.float32)

    h = h_ref[...]                                            # (Bb, Sb, H) native dtype
    w = w_ref[...].astype(h.dtype).reshape(1, 1, -1)          # (1, 1, H)
    b = b_ref[0]                                              # scalar from SMEM

    # raw scores: VPU multiply in the native dtype + f32-accumulated lane reduce.
    # keepdims keeps Sb on sublanes -> the context broadcast below needs no relayout.
    scores = jnp.sum(h * w, axis=-1, keepdims=True, dtype=jnp.float32) + b  # (Bb, Sb, 1)

    # --- online softmax update -------------------------------------------------
    m_prev = m_ref[...]                                       # (Bb, 1)
    m_new = jnp.maximum(m_prev, jnp.max(scores, axis=1))      # (Bb, 1)
    alpha = jnp.exp(m_prev - m_new)                           # (Bb, 1)
    p = jnp.exp(scores - m_new[:, :, None])                   # (Bb, Sb, 1) f32
    l_ref[...] = alpha * l_ref[...] + jnp.sum(p, axis=1)      # (Bb, 1)
    acc_ref[...] = alpha * acc_ref[...] + jnp.sum(p * h, axis=1)  # (Bb, H) f32
    m_ref[...] = m_new

    # stash raw scores in the resident lane-dense attw output block
    # (one small (Bb,Sb) sublane->lane relayout per step; normalized in finalize).
    s2d = jnp.reshape(scores, (scores.shape[0], scores.shape[1]))  # (Bb, Sb)
    if n_s_blocks == 1:
        attw_ref[...] = s2d
    else:
        off = pl.multiple_of(j * s_block, s_block)
        attw_ref[:, pl.ds(off, s_block)] = s2d

    @pl.when(j == n_s_blocks - 1)
    def _finalize():
        l = l_ref[...]
        inv = pl.reciprocal(l, approx=True)                   # EUP slot (free-ish)
        inv = inv * (2.0 - l * inv)                           # Newton refine #1
        inv = inv * (2.0 - l * inv)                           # Newton refine #2 -> f32 exact
        # normalize the stored raw scores in one lane-dense pass
        attw_ref[...] = jnp.exp(attw_ref[...] - m_ref[...]) * inv
        ctx_ref[...] = (acc_ref[...] * inv).astype(ctx_ref.dtype)


def _choose_blocks(B, S, H, itemsize, tile_bytes):
    """Adaptive block sizes targeting ~tile_bytes of hidden state per grid step."""
    per_row = max(1, S * H * itemsize)
    if B <= 8:
        bb = B                      # output blocks need sublane dim == full B or %8==0
    else:
        bb = max(8, (tile_bytes // per_row) // 8 * 8)
        bb = min(bb, 128)
        # keep >= 2 batch grid steps when possible (v7x has 2 TensorCores)
        while bb > 8 and -(-B // bb) < 2:
            bb -= 8
    max_sb = max(1, tile_bytes // max(1, bb * H * itemsize))
    if S <= max_sb:
        sb = S
    else:
        cands = [d for d in range(8, S, 8) if S % d == 0 and d <= max_sb]
        # TODO(synk): if S has no suitable divisor, we fall back to the whole row and
        # rely on the raised vmem_limit_bytes below.
        sb = max(cands) if cands else S
    return bb, sb


def attention_layer(hidden_states, weight, bias, *, tile_bytes=2 << 20):
    """Pallas equivalent of the PyTorch AttentionLayer.forward.

    hidden_states: [B, S, H] (any float dtype; kept native on the wire)
    weight:        [1, H]    (torch nn.Linear(hidden, 1).weight)
    bias:          [1]       (torch nn.Linear(hidden, 1).bias)
    returns: (context [B, H] in input dtype, attn_weights [B, S, 1] in float32)
    """
    B, S, H = hidden_states.shape
    in_dtype = hidden_states.dtype
    itemsize = jnp.dtype(in_dtype).itemsize

    Bb, Sb = _choose_blocks(B, S, H, itemsize, tile_bytes)
    nb = pl.cdiv(B, Bb)          # ragged last batch block handled by Pallas masking
    ns = S // Sb                 # Sb divides S by construction (or Sb == S)

    w = weight.reshape(1, H).astype(jnp.float32)     # lane-dense weight row
    b = bias.reshape(1).astype(jnp.float32)          # SMEM scalar

    # Explicit VMEM budget: double-buffered input tile + per-tile f32 intermediates
    # + scratch accumulators + double-buffered outputs + weight row.
    est = (2 * Bb * Sb * H * itemsize
           + 2 * Bb * Sb * H * 4
           + Bb * H * 4 + 4 * Bb * 4
           + 2 * (Bb * H * itemsize + Bb * S * 4)
           + 2 * H * 4)
    vmem_limit = int(min(64 << 20, max(32 << 20, 2 * est)))

    kernel = functools.partial(_attention_kernel, ns, Sb)

    ctx, attw = pl.pallas_call(
        kernel,
        out_shape=(
            jax.ShapeDtypeStruct((B, H), in_dtype),      # context
            jax.ShapeDtypeStruct((B, S), jnp.float32),   # attn weights (lane-dense)
        ),
        grid_spec=pltpu.PrefetchScalarGridSpec(
            num_scalar_prefetch=0,
            grid=(nb, ns),
            in_specs=[
                pl.BlockSpec((Bb, Sb, H), lambda i, j: (i, j, 0)),       # hidden tile
                pl.BlockSpec((1, H), lambda i, j: (0, 0)),               # weight row
                pl.BlockSpec(memory_space=pltpu.MemorySpace.SMEM),       # bias scalar
            ],
            out_specs=[
                pl.BlockSpec((Bb, H), lambda i, j: (i, 0)),              # context (resident)
                pl.BlockSpec((Bb, S), lambda i, j: (i, 0)),              # attw (resident)
            ],
            scratch_shapes=[
                pltpu.VMEM((Bb, 1), jnp.float32),    # running max m
                pltpu.VMEM((Bb, 1), jnp.float32),    # running sum l
                pltpu.VMEM((Bb, H), jnp.float32),    # context accumulator
            ],
        ),
        compiler_params=pltpu.CompilerParams(
            dimension_semantics=("parallel", "arbitrary"),
            vmem_limit_bytes=vmem_limit,
        ),
    )(hidden_states, w, b)

    context = ctx                                    # [B, H]
    attn_weights = attw[:, :, None]                  # [B, S, 1], like torch
    return context, attn_weights


def _reference(hidden_states, weight, bias):
    # Pure-JAX reference mirroring the PyTorch module.
    scores = jnp.einsum("bsh,oh->bso", hidden_states, weight) + bias  # [B, S, 1]
    attw = jax.nn.softmax(scores, axis=1)
    context = jnp.einsum("bso,bsh->bh", attw, hidden_states)
    return context, attw


if __name__ == "__main__":
    key = jax.random.PRNGKey(0)
    k_h, k_w, k_b = jax.random.split(key, 3)

    B, S, H = 2, 8, 32
    hidden_states = jax.random.normal(k_h, (B, S, H), dtype=jnp.float32)

    # nn.Linear(hidden_size, 1): weight [1, H], bias [1]
    bound = 1.0 / jnp.sqrt(H)
    weight = jax.random.uniform(k_w, (1, H), jnp.float32, -bound, bound)
    bias = jax.random.uniform(k_b, (1,), jnp.float32, -bound, bound)

    context, attn_weights = attention_layer(hidden_states, weight, bias)
    context = jax.block_until_ready(context)
    attn_weights = jax.block_until_ready(attn_weights)

    ref_ctx, ref_attw = _reference(hidden_states, weight, bias)
    assert context.shape == (B, H)
    assert attn_weights.shape == (B, S, 1)
    assert jnp.allclose(context, ref_ctx, atol=1e-5, rtol=1e-5)
    assert jnp.allclose(attn_weights, ref_attw, atol=1e-5, rtol=1e-5)

    print("KERNEL_OK")
</pallas_src>

<mosaic_0001>
module attributes {stable_mosaic.version = 11 : i64} {
  func.func @_attention_kernel(%arg0: i32, %arg1: i32, %arg2: memref<2x8x32xf32, #tpu.memory_space<vmem>>, %arg3: memref<1x32xf32, #tpu.memory_space<vmem>>, %arg4: memref<1xf32, #tpu.memory_space<smem>>, %arg5: memref<2x32xf32, #tpu.memory_space<vmem>>, %arg6: memref<2x8xf32, #tpu.memory_space<vmem>>, %arg7: memref<2x1xf32, #tpu.memory_space<vmem>>, %arg8: memref<2x1xf32, #tpu.memory_space<vmem>>, %arg9: memref<2x32xf32, #tpu.memory_space<vmem>>) attributes {dimension_semantics = [#tpu.dimension_semantics<parallel>, #tpu.dimension_semantics<arbitrary>], iteration_bounds = array<i64: 1, 1>, scalar_prefetch = 0 : i64, scratch_operands = 3 : i64, tpu.core_type = #tpu.core_type<tc>, window_params = [{transform_indices = @transform_0, window_bounds = array<i64: 2, 8, 32>}, {pipeline_mode = #tpu.pipeline_mode<synchronous>, transform_indices = @transform_1, window_bounds = array<i64: 1, 32>}, {transform_indices = @transform_2, window_bounds = array<i64: 1>}, {transform_indices = @transform_3, window_bounds = array<i64: 2, 32>}, {transform_indices = @transform_4, window_bounds = array<i64: 2, 8>}]} {
    %c0_i32 = arith.constant 0 : i32
    %0 = arith.cmpi eq, %arg1, %c0_i32 : i32
    %1 = arith.extui %0 : i1 to i32
    %c0_i32_0 = arith.constant 0 : i32
    %2 = arith.cmpi ne, %1, %c0_i32_0 : i32
    scf.if %2 {
      %cst_25 = arith.constant 0xFF800000 : f32
      %41 = vector.broadcast %cst_25 : f32 to vector<2x1xf32>
      %c0_26 = arith.constant 0 : index
      %c0_27 = arith.constant 0 : index
      %42 = vector.load %arg7[%c0_26, %c0_27] : memref<2x1xf32, #tpu.memory_space<vmem>>, vector<2x1xf32>
      tpu.vector_store %arg7[%c0_26, %c0_27], %41 {strides = array<i32>} : memref<2x1xf32, #tpu.memory_space<vmem>>, vector<2x1xf32>,
      %cst_28 = arith.constant 0.000000e+00 : f32
      %43 = vector.broadcast %cst_28 : f32 to vector<2x1xf32>
      %c0_29 = arith.constant 0 : index
      %c0_30 = arith.constant 0 : index
      %44 = vector.load %arg8[%c0_29, %c0_30] : memref<2x1xf32, #tpu.memory_space<vmem>>, vector<2x1xf32>
      tpu.vector_store %arg8[%c0_29, %c0_30], %43 {strides = array<i32>} : memref<2x1xf32, #tpu.memory_space<vmem>>, vector<2x1xf32>,
      %cst_31 = arith.constant 0.000000e+00 : f32
      %45 = vector.broadcast %cst_31 : f32 to vector<2x32xf32>
      %c0_32 = arith.constant 0 : index
      %c0_33 = arith.constant 0 : index
      %46 = vector.load %arg9[%c0_32, %c0_33] : memref<2x32xf32, #tpu.memory_space<vmem>>, vector<2x32xf32>
      tpu.vector_store %arg9[%c0_32, %c0_33], %45 {strides = array<i32>} : memref<2x32xf32, #tpu.memory_space<vmem>>, vector<2x32xf32>,
    } else {
    }
    %c0 = arith.constant 0 : index
    %c0_1 = arith.constant 0 : index
    %c0_2 = arith.constant 0 : index
    %3 = vector.load %arg2[%c0, %c0_1, %c0_2] : memref<2x8x32xf32, #tpu.memory_space<vmem>>, vector<2x8x32xf32>
    %c0_3 = arith.constant 0 : index
    %c0_4 = arith.constant 0 : index
    %4 = vector.load %arg3[%c0_3, %c0_4] : memref<1x32xf32, #tpu.memory_space<vmem>>, vector<1x32xf32>
    %5 = vector.shape_cast %4 : vector<1x32xf32> to vector<1x1x32xf32>
    %c0_5 = arith.constant 0 : index
    %6 = memref.load %arg4[%c0_5] : memref<1xf32, #tpu.memory_space<smem>>
    %7 = vector.broadcast %5 : vector<1x1x32xf32> to vector<2x8x32xf32>
    %8 = arith.mulf %3, %7 : vector<2x8x32xf32>
    %cst = arith.constant dense<0.000000e+00> : vector<2x8xf32>
    %9 = vector.multi_reduction <add>, %8, %cst [2] : vector<2x8x32xf32> to vector<2x8xf32>
    %10 = vector.shape_cast %9 : vector<2x8xf32> to vector<2x8x1xf32>
    %11 = vector.broadcast %6 : f32 to vector<2x8x1xf32>
    %12 = arith.addf %10, %11 : vector<2x8x1xf32>
    %c0_6 = arith.constant 0 : index
    %c0_7 = arith.constant 0 : index
    %13 = vector.load %arg7[%c0_6, %c0_7] : memref<2x1xf32, #tpu.memory_space<vmem>>, vector<2x1xf32>
    %cst_8 = arith.constant dense<0xFF800000> : vector<2x1xf32>
    %14 = vector.multi_reduction <maximumf>, %12, %cst_8 [1] : vector<2x8x1xf32> to vector<2x1xf32>
    %15 = arith.maximumf %13, %14 : vector<2x1xf32>
    %16 = arith.subf %13, %15 : vector<2x1xf32>
    %17 = math.exp %16 : vector<2x1xf32>
    %18 = vector.shape_cast %15 : vector<2x1xf32> to vector<2x1x1xf32>
    %19 = vector.broadcast %18 : vector<2x1x1xf32> to vector<2x8x1xf32>
    %20 = arith.subf %12, %19 : vector<2x8x1xf32>
    %21 = math.exp %20 : vector<2x8x1xf32>
    %c0_9 = arith.constant 0 : index
    %c0_10 = arith.constant 0 : index
    %22 = vector.load %arg8[%c0_9, %c0_10] : memref<2x1xf32, #tpu.memory_space<vmem>>, vector<2x1xf32>
    %23 = arith.mulf %17, %22 : vector<2x1xf32>
    %cst_11 = arith.constant dense<0.000000e+00> : vector<2x1xf32>
    %24 = vector.multi_reduction <add>, %21, %cst_11 [1] : vector<2x8x1xf32> to vector<2x1xf32>
    %25 = arith.addf %23, %24 : vector<2x1xf32>
    %c0_12 = arith.constant 0 : index
    %c0_13 = arith.constant 0 : index
    %26 = vector.load %arg8[%c0_12, %c0_13] : memref<2x1xf32, #tpu.memory_space<vmem>>, vector<2x1xf32>
    tpu.vector_store %arg8[%c0_12, %c0_13], %25 {strides = array<i32>} : memref<2x1xf32, #tpu.memory_space<vmem>>, vector<2x1xf32>,
    %c0_14 = arith.constant 0 : index
    %c0_15 = arith.constant 0 : index
    %27 = vector.load %arg9[%c0_14, %c0_15] : memref<2x32xf32, #tpu.memory_space<vmem>>, vector<2x32xf32>
    %28 = vector.broadcast %17 : vector<2x1xf32> to vector<2x32xf32>
    %29 = arith.mulf %28, %27 : vector<2x32xf32>
    %30 = vector.broadcast %21 : vector<2x8x1xf32> to vector<2x8x32xf32>
    %31 = arith.mulf %30, %3 : vector<2x8x32xf32>
    %cst_16 = arith.constant dense<0.000000e+00> : vector<2x32xf32>
    %32 = vector.multi_reduction <add>, %31, %cst_16 [1] : vector<2x8x32xf32> to vector<2x32xf32>
    %33 = arith.addf %29, %32 : vector<2x32xf32>
    %c0_17 = arith.constant 0 : index
    %c0_18 = arith.constant 0 : index
    %34 = vector.load %arg9[%c0_17, %c0_18] : memref<2x32xf32, #tpu.memory_space<vmem>>, vector<2x32xf32>
    tpu.vector_store %arg9[%c0_17, %c0_18], %33 {strides = array<i32>} : memref<2x32xf32, #tpu.memory_space<vmem>>, vector<2x32xf32>,
    %c0_19 = arith.constant 0 : index
    %c0_20 = arith.constant 0 : index
    %35 = vector.load %arg7[%c0_19, %c0_20] : memref<2x1xf32, #tpu.memory_space<vmem>>, vector<2x1xf32>
    tpu.vector_store %arg7[%c0_19, %c0_20], %15 {strides = array<i32>} : memref<2x1xf32, #tpu.memory_space<vmem>>, vector<2x1xf32>,
    %36 = vector.shape_cast %12 : vector<2x8x1xf32> to vector<2x8xf32>
    %c0_21 = arith.constant 0 : index
    %c0_22 = arith.constant 0 : index
    %37 = vector.load %arg6[%c0_21, %c0_22] : memref<2x8xf32, #tpu.memory_space<vmem>>, vector<2x8xf32>
    tpu.vector_store %arg6[%c0_21, %c0_22], %36 {strides = array<i32>} : memref<2x8xf32, #tpu.memory_space<vmem>>, vector<2x8xf32>,
    %c0_i32_23 = arith.constant 0 : i32
    %38 = arith.cmpi eq, %arg1, %c0_i32_23 : i32
    %39 = arith.extui %38 : i1 to i32
    %c0_i32_24 = arith.constant 0 : i32
    %40 = arith.cmpi ne, %39, %c0_i32_24 : i32
    scf.if %40 {
      %c0_25 = arith.constant 0 : index
      %c0_26 = arith.constant 0 : index
      %41 = vector.load %arg8[%c0_25, %c0_26] : memref<2x1xf32, #tpu.memory_space<vmem>>, vector<2x1xf32>
      %42 = tpu.reciprocal %41 {approx = true} : vector<2x1xf32> -> vector<2x1xf32>
      %43 = arith.mulf %41, %42 : vector<2x1xf32>
      %cst_27 = arith.constant 2.000000e+00 : f32
      %44 = vector.broadcast %cst_27 : f32 to vector<2x1xf32>
      %45 = arith.subf %44, %43 : vector<2x1xf32>
      %46 = arith.mulf %42, %45 : vector<2x1xf32>
      %47 = arith.mulf %41, %46 : vector<2x1xf32>
      %cst_28 = arith.constant 2.000000e+00 : f32
      %48 = vector.broadcast %cst_28 : f32 to vector<2x1xf32>
      %49 = arith.subf %48, %47 : vector<2x1xf32>
      %50 = arith.mulf %46, %49 : vector<2x1xf32>
      %c0_29 = arith.constant 0 : index
      %c0_30 = arith.constant 0 : index
      %51 = vector.load %arg6[%c0_29, %c0_30] : memref<2x8xf32, #tpu.memory_space<vmem>>, vector<2x8xf32>
      %c0_31 = arith.constant 0 : index
      %c0_32 = arith.constant 0 : index
      %52 = vector.load %arg7[%c0_31, %c0_32] : memref<2x1xf32, #tpu.memory_space<vmem>>, vector<2x1xf32>
      %53 = vector.broadcast %52 : vector<2x1xf32> to vector<2x8xf32>
      %54 = arith.subf %51, %53 : vector<2x8xf32>
      %55 = math.exp %54 : vector<2x8xf32>
      %56 = vector.broadcast %50 : vector<2x1xf32> to vector<2x8xf32>
      %57 = arith.mulf %55, %56 : vector<2x8xf32>
      %c0_33 = arith.constant 0 : index
      %c0_34 = arith.constant 0 : index
      %58 = vector.load %arg6[%c0_33, %c0_34] : memref<2x8xf32, #tpu.memory_space<vmem>>, vector<2x8xf32>
      tpu.vector_store %arg6[%c0_33, %c0_34], %57 {strides = array<i32>} : memref<2x8xf32, #tpu.memory_space<vmem>>, vector<2x8xf32>,
      %c0_35 = arith.constant 0 : index
      %c0_36 = arith.constant 0 : index
      %59 = vector.load %arg9[%c0_35, %c0_36] : memref<2x32xf32, #tpu.memory_space<vmem>>, vector<2x32xf32>
      %60 = vector.broadcast %50 : vector<2x1xf32> to vector<2x32xf32>
      %61 = arith.mulf %59, %60 : vector<2x32xf32>
      %c0_37 = arith.constant 0 : index
      %c0_38 = arith.constant 0 : index
      %62 = vector.load %arg5[%c0_37, %c0_38] : memref<2x32xf32, #tpu.memory_space<vmem>>, vector<2x32xf32>
      tpu.vector_store %arg5[%c0_37, %c0_38], %61 {strides = array<i32>} : memref<2x32xf32, #tpu.memory_space<vmem>>, vector<2x32xf32>,
    } else {
    }
    return
  }
  func.func @transform_0(%arg0: i32, %arg1: i32) -> (i32, i32, i32) {
    %c0_i32 = arith.constant 0 : i32
    %c0_i32_0 = arith.constant 0 : i32
    return %arg0, %arg1, %c0_i32 : i32, i32, i32
  }
  func.func @transform_1(%arg0: i32, %arg1: i32) -> (i32, i32) {
    %c0_i32 = arith.constant 0 : i32
    %c0_i32_0 = arith.constant 0 : i32
    %c0_i32_1 = arith.constant 0 : i32
    return %c0_i32, %c0_i32_0 : i32, i32
  }
  func.func @transform_2(%arg0: i32, %arg1: i32) -> i32 {
    %c0_i32 = arith.constant 0 : i32
    %c0_i32_0 = arith.constant 0 : i32
    return %c0_i32 : i32
  }
  func.func @transform_3(%arg0: i32, %arg1: i32) -> (i32, i32) {
    %c0_i32 = arith.constant 0 : i32
    %c0_i32_0 = arith.constant 0 : i32
    return %arg0, %c0_i32 : i32, i32
  }
  func.func @transform_4(%arg0: i32, %arg1: i32) -> (i32, i32) {
    %c0_i32 = arith.constant 0 : i32
    %c0_i32_0 = arith.constant 0 : i32
    return %arg0, %c0_i32 : i32, i32
  }
}

</mosaic_0001>

<bundles_post_ra>
// kernel: tpu_custom_call.1
= control target key start
LH: loop header
LB: loop body
LE: loop exit
PB: predicated region body
PF: predicated region fallthrough
CT: control target
= control target key end

     0   :  { %11 = vsyncpa [#allocation7], 0  ;;  %s428_s0 = inlined_call_operand.hbm [shape: f32[2,8,32], index: 0, kind: input, shape index: {}]   ;;  %s429_s1 = inlined_call_operand.vmem [shape: f32[1,32], index: 1, kind: input, shape index: {}]   ;;  %s430_s2 = inlined_call_operand.<no memory space> [shape: f32[1], index: 2, kind: input, shape index: {}]   ;;  %s431_s3 = inlined_call_operand.hbm [shape: f32[2,32], index: 3, kind: output, shape index: {0}]   ;;  %s432_s4 = inlined_call_operand.hbm [shape: f32[2,8], index: 4, kind: output, shape index: {1}]  }
   0x1   :  { %12 = vsyncpa [#allocation8], 0 }
   0x2   :  { %13 = vsyncpa [#allocation11], 0  ;;  %s354_s15 = smov [#allocation6]  }
   0x3   :  { %s19_s16 = sshll.u32 %s354_s15, 4  ;;  %s20_s16 = int_to_ptr.vmem [resolvable:$true] %s19_s16 }
   0x4   :  { %s296_s17 = scalar_lea.vmem %s20_s16, 256  ;;  %p301_p1 = scmp.lt.s32.totalorder %s20_s16, %s20_s16 }
   0x5   :  { %p297_p0 = scmp.ne.s32.totalorder %s20_s16, %s296_s17  ;;  %p302_p2 = scmp.lt.s32.totalorder %s296_s17, %s296_s17 }
   0x7   :  { %p303_p3 = por %p302_p2, %p301_p1 }
   0x9   :  { %p304_p4 = pnand %p303_p3, %p297_p0 }
   0xb   :  { %307 = shalt.err (!%p304_p4)
}
   0xc   :  { %s355_s18 = smov 128   ;;  %s356_s19 = smov 8  }
   0xd   :  { %25 = dma.hbm_to_vmem [thread:$0]  %s428_s0, 256, %s20_s16, [#allocation7], %s355_s18, %s355_s18, %s356_s19  }
   0xe   :  { %348 = dma.done.wait [#allocation7], 256  }
   0xf   :  { %349 = vsyncadd [#allocation7], 4294967040  ;;  %v391_v0 = vld [vmem:[#allocation6] sm:$0xff]  ;;  %v266_v1 = vld [vmem:[%s429_s1] ss:$0 sm:$0xff]  ;;  %vm54_vm0 = vcmask 261120   ;;  %v90_v10 = vlaneseq  ;;  %v61_v11 = vstv %s430_s2 }
  0x10   :  { %v396_v2 = vld [vmem:[#allocation6 + $0x8] sm:$0xff]  ;;  %v52_v3 = vmul.f32 %v266_v1, %v391_v0  ;;  %vm37_vm1 = vcmask 1024   ;;  %v357_v7 = vmov -inf   ;;  %v358_v8 = vmov 0.0   ;;  %s361_s2 = smov [#allocation9]   ;;  %s362_s25 = smov [#allocation10]  }
  0x11   :  { %v53_v4 = vmul.f32 %v266_v1, %v396_v2  ;;  %38 = vst.msk [vmem:[#allocation2] sm:$0x3] %vm37_vm1, %v357_v7  ;;  %39 = vst.msk [vmem:[#allocation3] sm:$0x3] %vm37_vm1, %v358_v8  ;;  %v359_v9 = vmov 0   ;;  %v91_v12 = vshrl.u32 %v90_v10, 7 }
  0x12   :  { %v55_v5 = vsel %vm54_vm0, %v52_v3, 0.0  ;;  %277 = vset.pattern.permute.xlu0 %v359_v9  ;;  %276 = vset.pattern.permute.xlu1 %v359_v9  ;;  %v193_v13 = vand.u32 127, %v90_v10  ;;  %vm79_vm2 = vcmask 1041409   ;;  %vm204_vm3 = vcmask 58368   ;;  %s243_s24 = sshll.u32 %s361_s2, 4  ;;  %s253_s26 = sshll.u32 %s362_s25, 4  ;;  %s244_s24 = int_to_ptr.vmem [resolvable:$true] %s243_s24  ;;  %s254_s26 = int_to_ptr.vmem [resolvable:$true] %s253_s26 }
  0x13   :  { %56 = vadd.xlane.f32.xlu0 %v55_v5  ;;  %v58_v6 = vsel %vm54_vm0, %v53_v4, 0.0  ;;  %v360_v28 = vmov 1966171168   ;;  %v111_v41 = vsub.s32 0, %v91_v12  ;;  %vm40_vm4 = vcmask 254976   ;;  %s308_s27 = scalar_lea.vmem %s244_s24, 32  ;;  %p313_p6 = scmp.lt.s32.totalorder %s244_s24, %s244_s24 }
  0x14   :  { %v196_v16 = vsub.s32 %v193_v13, %v91_v12  ;;  %v88_v29 = vunpack.c.l.s4 %v360_v28  ;;  %41 = vst.msk [vmem:[#allocation4] sm:$0x3] %vm40_vm4, %v358_v8  ;;  %vm127_vm5 = vcmask 7168   ;;  %p309_p5 = scmp.ne.s32.totalorder %s244_s24, %s308_s27  ;;  %p314_p7 = scmp.lt.s32.totalorder %s308_s27, %s308_s27 }
  0x16   :  { %v89_v33 = vunpack.c.0.s8 %v88_v29  ;;  %p315_p8 = por %p314_p7, %p313_p6 }
  0x17   :  { %59 = vadd.xlane.f32.xlu0 %v58_v6 }
  0x18   :  { %v64_v36 = vld [vmem:[#allocation2] sm:$0x3]  ;;  %v92_v38 = vsub.s32 %v89_v33, %v91_v12  ;;  %v125_v7 = vld [vmem:[#allocation3] sm:$0x3]  ;;  %p316_p9 = pnand %p315_p8, %p309_p5 }
  0x9c   :  { %v57_v14 = vpop.xlane.xlu0 %56 }
  0x9d   :  { %v62_v15 = vadd.f32 %v61_v11, %v57_v14 }
  0x9f   :  { %v65_v17 = vrot.slane %v62_v15, 4  ;;  %v197_v22 = vrot.slane %v62_v15, %v196_v16 }
  0xa0   :  { %v60_v18 = vpop.xlane.xlu0 %59 }
  0xa1   :  { %v66_v19 = vmax.f32 %v62_v15, %v65_v17  ;;  %v63_v20 = vadd.f32 %v61_v11, %v60_v18 }
  0xa3   :  { %v67_v21 = vrot.slane %v66_v19, 2  ;;  %v71_v23 = vrot.slane %v63_v20, 4  ;;  %v201_v24 = vrot.slane %v63_v20, %v196_v16 }
  0xa5   :  { %v68_v25 = vmax.f32 %v66_v19, %v67_v21  ;;  %v72_v26 = vmax.f32 %v63_v20, %v71_v23  ;;  %v202_v27 = vsel %vm79_vm2, %v201_v24, %v197_v22 }
  0xa6   :  { %205 = vst.msk [vmem:[#allocation10] sm:$0x3] %vm204_vm3, %v202_v27 }
  0xa7   :  { %v73_v30 = vrot.slane %v72_v26, 2  ;;  %v69_v31 = vrot.slane %v68_v25, 1 }
  0xa9   :  { %v74_v32 = vmax.f32 %v72_v26, %v73_v30  ;;  %v70_v35 = vmax.f32 %v68_v25, %v69_v31 }
  0xab   :  { %v75_v34 = vrot.slane %v74_v32, 1 }
  0xad   :  { %v76_v37 = vmax.f32 %v74_v32, %v75_v34 }
  0xaf   :  { %v80_v39 = vsel %vm79_vm2, %v76_v37, %v70_v35 }
  0xb0   :  { %v82_v40 = vmax.f32 %v64_v36, %v80_v39 }
  0xb2   :  { %v93_v42 = vrot.slane %v82_v40, %v92_v38  ;;  %189 = vst.msk [vmem:[#allocation2] sm:$0x3] %vm37_vm1, %v82_v40  ;;  %v83_v52 = vsub.f32 %v64_v36, %v82_v40 }
  0xb4   :  { %v94_v43 = vcombine.high %v93_v42, %v93_v42  ;;  %v101_v44 = vrot.slane %v93_v42, %v92_v38  ;;  %v84_v54 = vmul.f32 1.442695, %v83_v52 }
  0xb6   :  { %v108_v45 = vrot.slane %v94_v43, %v92_v38  ;;  %v112_v46 = vrot.slane %v101_v44, %v111_v41  ;;  %v149_v38 = vld [vmem:[#allocation4] sm:$0x3]  ;;  %v217_v44 = vld [vmem:[#allocation10] sm:$0x3] }
  0xb8   :  { %v116_v47 = vrot.slane %v108_v45, %v111_v41  ;;  %v119_v48 = vsub.f32 %v62_v15, %v112_v46 }
  0xb9   :  { %v218_v49 = vld [vmem:[#allocation2] sm:$0x3] }
  0xba   :  { %v120_v50 = vsub.f32 %v63_v20, %v116_v47  ;;  %221 = vperm.xlu0 %277, %v218_v49   ;;  %v121_v51 = vmul.f32 1.442695, %v119_v48 }
  0xbc   :  { %v123_v53 = vmul.f32 1.442695, %v120_v50  ;;  %278 = vpow2.f32 %v121_v51 }
  0xbe   :  { %280 = vpow2.f32 %v123_v53 }
  0xbf   :  { %282 = vpow2.f32 %v84_v54 }
  0xc9   :  { %v279_v55 = vpop.eup %278 }
  0xca   :  { %158 = vperm.xlu1 %276, %v279_v55   ;;  %v128_v56 = vsel %vm127_vm5, %v279_v55, 0.0 }
  0xcb   :  { %v281_v57 = vpop.eup %280  ;;  %v129_v58 = vrot.slane %v128_v56, 4 }
  0xcc   :  { %v135_v59 = vsel %vm127_vm5, %v281_v57, 0.0  ;;  %v283_v1 = vpop.eup %282 }
  0xcd   :  { %v136_v60 = vrot.slane %v135_v59, 4  ;;  %v130_v61 = vadd.f32 %v129_v58, %v128_v56  ;;  %v126_v11 = vmul.f32 %v283_v1, %v125_v7 }
  0xce   :  { %163 = vperm.xlu1 %276, %v281_v57  }
  0xcf   :  { %v137_v62 = vadd.f32 %v136_v60, %v135_v59  ;;  %v131_v63 = vrot.slane %v130_v61, 2 }
  0xd1   :  { %v138_v3 = vrot.slane %v137_v62, 2  ;;  %v132_v4 = vadd.f32 %v131_v63, %v130_v61 }
  0xd2   :  { %152 = vperm.xlu1 %276, %v283_v1  }
  0xd3   :  { %v139_v5 = vadd.f32 %v138_v3, %v137_v62  ;;  %v133_v6 = vrot.slane %v132_v4, 1 }
  0xd5   :  { %v140_v8 = vrot.slane %v139_v5, 1  ;;  %v134_v10 = vadd.f32 %v133_v6, %v132_v4 }
  0xd7   :  { %v141_v9 = vadd.f32 %v140_v8, %v139_v5 }
  0xd9   :  { %v144_v12 = vsel %vm79_vm2, %v141_v9, %v134_v10 }
  0xda   :  { %v146_v13 = vadd.f32 %v144_v12, %v126_v11 }
  0xdc   :  { %148 = vst.msk [vmem:[#allocation3] sm:$0x3] %vm37_vm1, %v146_v13 }
  0xe3   :  { %v209_v14 = vld [vmem:[#allocation3] sm:$0x3] }
  0xe4   :  { %284 = vrcp.f32 %v209_v14 }
  0xf1   :  { %v285_v15 = vpop.eup %284 }
  0xf2   :  { %v211_v16 = vmul.f32 %v285_v15, %v209_v14 }
  0xf4   :  { %v212_v17 = vsub.f32 2.0, %v211_v16 }
  0xf6   :  { %v213_v18 = vmul.f32 %v285_v15, %v212_v17 }
  0xf8   :  { %v214_v19 = vmul.f32 %v213_v18, %v209_v14 }
  0xfa   :  { %v215_v20 = vsub.f32 2.0, %v214_v19 }
  0xfc   :  { %v216_v21 = vmul.f32 %v215_v20, %v213_v18 }
  0xfe   :  { %229 = vperm.xlu1 %276, %v216_v21  }
 0x145   :  { %v159_v22 = vpop.permute.xlu1 %158 }
 0x146   :  { %v166_v23 = vmul.f32 %v159_v22, %v391_v0 }
 0x148   :  { %v168_v24 = vsel %vm54_vm0, %v166_v23, 0.0 }
 0x149   :  { %v169_v25 = vrot.slane %v168_v24, 4  ;;  %v164_v26 = vpop.permute.xlu1 %163 }
 0x14a   :  { %v167_v27 = vmul.f32 %v164_v26, %v396_v2  ;;  %v222_v2 = vpop.permute.xlu0 %221 }
 0x14b   :  { %v170_v28 = vadd.f32 %v169_v25, %v168_v24  ;;  %v224_v45 = vsub.f32 %v217_v44, %v222_v2 }
 0x14c   :  { %v175_v29 = vsel %vm54_vm0, %v167_v27, 0.0 }
 0x14d   :  { %v171_v30 = vrot.slane %v170_v28, 2  ;;  %v176_v31 = vrot.slane %v175_v29, 4  ;;  %v153_v39 = vpop.permute.xlu1 %152  ;;  %v225_v46 = vmul.f32 1.442695, %v224_v45 }
 0x14e   :  { %v155_v41 = vmul.f32 %v153_v39, %v149_v38 }
 0x14f   :  { %v172_v32 = vadd.f32 %v171_v30, %v170_v28  ;;  %v177_v33 = vadd.f32 %v176_v31, %v175_v29  ;;  %286 = vpow2.f32 %v225_v46 }
 0x151   :  { %v178_v34 = vrot.slane %v177_v33, 2  ;;  %v173_v35 = vrot.slane %v172_v32, 1 }
 0x153   :  { %v179_v36 = vadd.f32 %v178_v34, %v177_v33  ;;  %v174_v0 = vadd.f32 %v173_v35, %v172_v32 }
 0x155   :  { %v180_v37 = vrot.slane %v179_v36, 1 }
 0x157   :  { %v181_v40 = vadd.f32 %v180_v37, %v179_v36 }
 0x159   :  { %v184_v42 = vsel %vm79_vm2, %v181_v40, %v174_v0 }
 0x15a   :  { %v186_v43 = vadd.f32 %v184_v42, %v155_v41 }
 0x15c   :  { %188 = vst.msk [vmem:[#allocation4] sm:$0x3] %vm40_vm4, %v186_v43  ;;  %v287_v47 = vpop.eup %286 }
 0x163   :  { %v234_v48 = vld [vmem:[#allocation4] sm:$0x3] }
 0x179   :  { %v230_v49 = vpop.permute.xlu1 %229 }
 0x17a   :  { %v232_v50 = vmul.f32 %v287_v47, %v230_v49  ;;  %v235_v51 = vmul.f32 %v234_v48, %v230_v49 }
 0x17c   :  { %233 = vst.msk [vmem:[#allocation10] sm:$0x3] %vm204_vm3, %v232_v50 }
 0x17d   :  { %236 = vst.msk [vmem:[#allocation9] sm:$0x3] %vm40_vm4, %v235_v51 }
 0x17e   :  { %319 = shalt.err (!%p316_p9)
}
 0x17f   :  { %246 = dma.vmem_to_hbm [thread:$0]  %s244_s24, 32, %s431_s3, [#allocation8]  }
 0x180   :  { %s328_s30 = scalar_lea.vmem %s254_s26, 32  ;;  %p333_p11 = scmp.lt.s32.totalorder %s254_s26, %s254_s26 }
 0x181   :  { %p329_p10 = scmp.ne.s32.totalorder %s254_s26, %s328_s30  ;;  %p334_p12 = scmp.lt.s32.totalorder %s328_s30, %s328_s30 }
 0x183   :  { %p335_p13 = por %p334_p12, %p333_p11 }
 0x185   :  { %p336_p0 = pnand %p335_p13, %p329_p10 }
 0x187   :  { %339 = shalt.err (!%p336_p0)
}
 0x188   :  { %256 = dma.vmem_to_hbm [thread:$0]  %s254_s26, 32, %s432_s4, [#allocation11]  }
 0x189   :  { %350 = dma.done.wait [#allocation8], 32  }
 0x18a   :  { %351 = vsyncadd [#allocation8], 4294967264 }
 0x18b   :  { %352 = dma.done.wait [#allocation11], 32  }
 0x18c   :  { %353 = vsyncadd [#allocation11], 4294967264 }
 0x18d   :  { %263 = vsyncpa [#allocation7], 1 }
 0x18e   :  { %264 = vsyncpa [#allocation8], 1 }
 0x18f   :  { %265 = vsyncpa [#allocation11], 1 }

</bundles_post_ra>
